<compile_context>
chip_gen: v7x
topology: tpu7x:2x2x1
jax: 0.10.0
libtpu: 0.0.40
codegen_flags: <defaults>
</compile_context>

<pallas_src>
import functools

import jax
import jax.numpy as jnp
from jax import lax
from jax.experimental import pallas as pl
from jax.experimental.pallas import tpu as pltpu


# ~working set per grid step ≈ 2*(x block) + 2*(out block) + f32 temporaries;
# a 4 MiB block keeps that well under the 48 MiB scoped VMEM limit we request
# (and under v7x's 64 MiB physical VMEM) while making per-step overhead
# negligible versus HBM transfer time.
_DEFAULT_BLOCK_BUDGET = 4 * 1024 * 1024
_VMEM_LIMIT = 48 * 1024 * 1024


# ---------------------------------------------------------------------------
# Path 1: fused single-pass kernel, one (Bt, C, HW) block per grid step.
# ---------------------------------------------------------------------------
def _se_fused_kernel(x_ref, w1_ref, w2_ref, o_ref):
    # x_ref: (Bt, C, HW)   w1_ref: (C, Cr)   w2_ref: (Cr, C)   o_ref: (Bt, C, HW)
    xv = x_ref[...]
    # Global average pool over spatial dims, accumulated in fp32 -> (Bt, C).
    pooled = jnp.mean(xv.astype(jnp.float32), axis=-1)
    # Squeeze: Linear(C -> C//r, no bias) + ReLU.
    h = jnp.dot(pooled, w1_ref[...].astype(jnp.float32),
                preferred_element_type=jnp.float32)                 # (Bt, Cr)
    h = jnp.maximum(h, 0.0)
    # Excite: Linear(C//r -> C, no bias) + Sigmoid.
    g = jnp.dot(h, w2_ref[...].astype(jnp.float32),
                preferred_element_type=jnp.float32)                 # (Bt, C)
    g = jax.nn.sigmoid(g)
    # Broadcast gate over HW and scale; cast only at the store.
    o_ref[...] = (xv.astype(jnp.float32) * g[:, :, None]).astype(o_ref.dtype)


# ---------------------------------------------------------------------------
# Path 2a: pooling + gate kernel (HW tiled, accumulate in VMEM scratch).
# ---------------------------------------------------------------------------
def _se_pool_gate_kernel(x_ref, w1_ref, w2_ref, gate_ref, acc_ref, *,
                         hw_total, hw_tile):
    # x_ref: (1, C, hw_tile)   gate_ref: (1, C)   acc_ref: VMEM (1, C) f32
    t = pl.program_id(1)

    @pl.when(t == 0)
    def _():
        acc_ref[...] = jnp.zeros_like(acc_ref)

    xf = x_ref[...].astype(jnp.float32)
    # Mask columns past the true H*W (tail tile); divide by hw_total, never by
    # the padded length.
    col = t * hw_tile + lax.broadcasted_iota(jnp.int32, xf.shape, 2)
    xf = jnp.where(col < hw_total, xf, 0.0)
    acc_ref[...] += jnp.sum(xf, axis=-1)                             # (1, C)

    @pl.when(t == pl.num_programs(1) - 1)
    def _():
        pooled = acc_ref[...] * (1.0 / float(hw_total))              # (1, C)
        h = jnp.maximum(
            jnp.dot(pooled, w1_ref[...].astype(jnp.float32),
                    preferred_element_type=jnp.float32), 0.0)
        g = jax.nn.sigmoid(
            jnp.dot(h, w2_ref[...].astype(jnp.float32),
                    preferred_element_type=jnp.float32))
        gate_ref[...] = g


# ---------------------------------------------------------------------------
# Path 2b: elementwise scale kernel (fully parallel grid).
# ---------------------------------------------------------------------------
def _se_scale_kernel(gate_ref, x_ref, o_ref):
    # gate_ref: (1, C) f32   x_ref/o_ref: (1, C, hw_tile)
    g = gate_ref[...][:, :, None]                                    # (1, C, 1)
    o_ref[...] = (x_ref[...].astype(jnp.float32) * g).astype(o_ref.dtype)


def _pick_hw_tile(C, HW, itemsize, block_budget_bytes):
    """Largest lane-dense (multiple of 128) HW tile that fits the block budget."""
    per_col = C * itemsize
    max_cols = max(1, block_budget_bytes // per_col)
    if max_cols >= HW:
        return HW
    tile = (max_cols // 128) * 128
    if tile == 0:
        tile = min(HW, 128)
    return tile


def se_layer(x, w1, w2, *, block_budget_bytes=_DEFAULT_BLOCK_BUDGET):
    """Squeeze-and-Excitation forward.

    x : (B, C, H, W), float32 or bfloat16.
    w1: (C, C//r)   first FC weight (pre-transposed for `pooled @ w1`).
    w2: (C//r, C)   second FC weight (pre-transposed for `h @ w2`).
    """
    B, C, H, W = x.shape
    HW = H * W
    x3 = x.reshape(B, C, HW)
    itemsize = x3.dtype.itemsize
    per_batch_bytes = C * HW * itemsize

    if per_batch_bytes <= block_budget_bytes:
        # ---------------- fused single pass ----------------
        bt = int(min(B, max(1, block_budget_bytes // per_batch_bytes)))
        grid = ((B + bt - 1) // bt,)
        # NOTE: input_output_aliases={0: 0} could be added if the caller
        # donates x (halves the HBM footprint; traffic is unchanged).
        out3 = pl.pallas_call(
            _se_fused_kernel,
            out_shape=jax.ShapeDtypeStruct((B, C, HW), x.dtype),
            grid_spec=pltpu.PrefetchScalarGridSpec(
                num_scalar_prefetch=0,
                grid=grid,
                in_specs=[
                    pl.BlockSpec((bt, C, HW), lambda b: (b, 0, 0)),
                    pl.BlockSpec(w1.shape, lambda b: (0, 0)),
                    pl.BlockSpec(w2.shape, lambda b: (0, 0)),
                ],
                out_specs=pl.BlockSpec((bt, C, HW), lambda b: (b, 0, 0)),
            ),
            compiler_params=pltpu.CompilerParams(
                dimension_semantics=("parallel",),
                vmem_limit_bytes=_VMEM_LIMIT),
        )(x3, w1, w2)
        return out3.reshape(B, C, H, W)

    # ---------------- two-pass: pool+gate, then scale ----------------
    hw_tile = _pick_hw_tile(C, HW, itemsize, block_budget_bytes)
    n_hw = (HW + hw_tile - 1) // hw_tile

    gate = pl.pallas_call(
        functools.partial(_se_pool_gate_kernel, hw_total=HW, hw_tile=hw_tile),
        out_shape=jax.ShapeDtypeStruct((B, C), jnp.float32),
        grid_spec=pltpu.PrefetchScalarGridSpec(
            num_scalar_prefetch=0,
            grid=(B, n_hw),
            in_specs=[
                pl.BlockSpec((1, C, hw_tile), lambda b, t: (b, 0, t)),
                pl.BlockSpec(w1.shape, lambda b, t: (0, 0)),
                pl.BlockSpec(w2.shape, lambda b, t: (0, 0)),
            ],
            out_specs=pl.BlockSpec((1, C), lambda b, t: (b, 0)),
            scratch_shapes=[pltpu.VMEM((1, C), jnp.float32)],
        ),
        compiler_params=pltpu.CompilerParams(
            dimension_semantics=("parallel", "arbitrary"),
            vmem_limit_bytes=_VMEM_LIMIT),
    )(x3, w1, w2)

    out3 = pl.pallas_call(
        _se_scale_kernel,
        out_shape=jax.ShapeDtypeStruct((B, C, HW), x.dtype),
        grid_spec=pltpu.PrefetchScalarGridSpec(
            num_scalar_prefetch=0,
            grid=(B, n_hw),
            in_specs=[
                pl.BlockSpec((1, C), lambda b, t: (b, 0)),
                pl.BlockSpec((1, C, hw_tile), lambda b, t: (b, 0, t)),
            ],
            out_specs=pl.BlockSpec((1, C, hw_tile), lambda b, t: (b, 0, t)),
        ),
        compiler_params=pltpu.CompilerParams(
            dimension_semantics=("parallel", "parallel"),
            vmem_limit_bytes=_VMEM_LIMIT),
    )(gate, x3)
    return out3.reshape(B, C, H, W)
    # TODO(synk): for tiny spatial maps (HW not a multiple of 128, e.g. 7x7)
    # an NHWC-style (B, HW, C) layout with C>=128 on lanes would avoid masked
    # partial stores; not needed for the lane-dense shapes exercised here.


def se_layer_ref(x, w1, w2):
    """Pure-JAX reference matching the PyTorch forward."""
    y = jnp.mean(x, axis=(2, 3))                  # (B, C) adaptive avg pool -> 1x1
    y = jnp.maximum(y @ w1, 0.0)                  # (B, C//r)
    y = jax.nn.sigmoid(y @ w2)                    # (B, C)
    return x * y[:, :, None, None]


if __name__ == "__main__":
    B, C, H, W = 2, 64, 16, 16
    reduction = 16
    Cr = C // reduction

    key = jax.random.PRNGKey(0)
    kx, k1, k2 = jax.random.split(key, 3)
    x = jax.random.normal(kx, (B, C, H, W), dtype=jnp.float32)
    # Weights stored pre-transposed for y = pooled @ w (no in-kernel transposes).
    w1 = jax.random.normal(k1, (C, Cr), dtype=jnp.float32) * 0.1
    w2 = jax.random.normal(k2, (Cr, C), dtype=jnp.float32) * 0.1

    ref = se_layer_ref(x, w1, w2)

    # Fused single-pass path (block fits comfortably in VMEM).
    out = jax.block_until_ready(se_layer(x, w1, w2))
    assert out.shape == (B, C, H, W)
    assert jnp.allclose(out, ref, atol=1e-5, rtol=1e-5), "fused path mismatch"

    # Two-pass path (pool+gate, then scale), forced via a tiny block budget to
    # exercise the large-C*HW code path on these small shapes.
    out2 = jax.block_until_ready(se_layer(x, w1, w2, block_budget_bytes=32 * 1024))
    assert jnp.allclose(out2, ref, atol=1e-5, rtol=1e-5), "two-pass mismatch"

    # bf16 I/O (compute stays fp32 in-kernel) — recommended dtype on v6e/v7x.
    xb = x.astype(jnp.bfloat16)
    outb = jax.block_until_ready(se_layer(xb, w1, w2))
    refb = se_layer_ref(xb.astype(jnp.float32), w1, w2)
    assert jnp.allclose(outb.astype(jnp.float32), refb, atol=5e-2, rtol=5e-2), \
        "bf16 path mismatch"

    print("KERNEL_OK")
</pallas_src>

<mosaic_0001>
module attributes {stable_mosaic.version = 11 : i64} {
  func.func @_se_fused_kernel(%arg0: i32, %arg1: memref<2x64x256xf32, #tpu.memory_space<vmem>>, %arg2: memref<64x4xf32, #tpu.memory_space<vmem>>, %arg3: memref<4x64xf32, #tpu.memory_space<vmem>>, %arg4: memref<2x64x256xf32, #tpu.memory_space<vmem>>) attributes {dimension_semantics = [#tpu.dimension_semantics<parallel>], iteration_bounds = array<i64: 1>, scalar_prefetch = 0 : i64, scratch_operands = 0 : i64, tpu.core_type = #tpu.core_type<tc>, window_params = [{transform_indices = @transform_0, window_bounds = array<i64: 2, 64, 256>}, {pipeline_mode = #tpu.pipeline_mode<synchronous>, transform_indices = @transform_1, window_bounds = array<i64: 64, 4>}, {pipeline_mode = #tpu.pipeline_mode<synchronous>, transform_indices = @transform_2, window_bounds = array<i64: 4, 64>}, {transform_indices = @transform_3, window_bounds = array<i64: 2, 64, 256>}]} {
    %c0 = arith.constant 0 : index
    %c0_0 = arith.constant 0 : index
    %c0_1 = arith.constant 0 : index
    %0 = vector.load %arg1[%c0, %c0_0, %c0_1] : memref<2x64x256xf32, #tpu.memory_space<vmem>>, vector<2x64x256xf32>
    %cst = arith.constant dense<0.000000e+00> : vector<2x64xf32>
    %1 = vector.multi_reduction <add>, %0, %cst [2] : vector<2x64x256xf32> to vector<2x64xf32>
    %cst_2 = arith.constant 2.560000e+02 : f32
    %2 = vector.broadcast %cst_2 : f32 to vector<2x64xf32>
    %3 = arith.divf %1, %2 : vector<2x64xf32>
    %c0_3 = arith.constant 0 : index
    %c0_4 = arith.constant 0 : index
    %4 = vector.load %arg2[%c0_3, %c0_4] : memref<64x4xf32, #tpu.memory_space<vmem>>, vector<64x4xf32>
    %cst_5 = arith.constant dense<0.000000e+00> : vector<2x4xf32>
    %5 = tpu.matmul %3, %4, %cst_5 {dimension_numbers = #tpu.dot_dimension_numbers<[1], [0], [0], [1], [0, 0, 1, 1], [], []>} : vector<2x64xf32>, vector<64x4xf32>, vector<2x4xf32> -> vector<2x4xf32>
    %cst_6 = arith.constant 0.000000e+00 : f32
    %6 = vector.broadcast %cst_6 : f32 to vector<2x4xf32>
    %7 = arith.maximumf %5, %6 : vector<2x4xf32>
    %c0_7 = arith.constant 0 : index
    %c0_8 = arith.constant 0 : index
    %8 = vector.load %arg3[%c0_7, %c0_8] : memref<4x64xf32, #tpu.memory_space<vmem>>, vector<4x64xf32>
    %cst_9 = arith.constant dense<0.000000e+00> : vector<2x64xf32>
    %9 = tpu.matmul %7, %8, %cst_9 {dimension_numbers = #tpu.dot_dimension_numbers<[1], [0], [0], [1], [0, 0, 1, 1], [], []>} : vector<2x4xf32>, vector<4x64xf32>, vector<2x64xf32> -> vector<2x64xf32>
    %10 = arith.negf %9 : vector<2x64xf32>
    %11 = math.exp %10 : vector<2x64xf32>
    %cst_10 = arith.constant 1.000000e+00 : f32
    %12 = vector.broadcast %cst_10 : f32 to vector<2x64xf32>
    %13 = arith.addf %12, %11 : vector<2x64xf32>
    %14 = arith.divf %12, %13 : vector<2x64xf32>
    %15 = vector.shape_cast %14 : vector<2x64xf32> to vector<2x64x1xf32>
    %16 = vector.broadcast %15 : vector<2x64x1xf32> to vector<2x64x256xf32>
    %17 = arith.mulf %0, %16 : vector<2x64x256xf32>
    %c0_11 = arith.constant 0 : index
    %c0_12 = arith.constant 0 : index
    %c0_13 = arith.constant 0 : index
    %18 = vector.load %arg4[%c0_11, %c0_12, %c0_13] : memref<2x64x256xf32, #tpu.memory_space<vmem>>, vector<2x64x256xf32>
    tpu.vector_store %arg4[%c0_11, %c0_12, %c0_13], %17 {strides = array<i32>} : memref<2x64x256xf32, #tpu.memory_space<vmem>>, vector<2x64x256xf32>,
    return
  }
  func.func @transform_0(%arg0: i32) -> (i32, i32, i32) {
    %c0_i32 = arith.constant 0 : i32
    %c0_i32_0 = arith.constant 0 : i32
    %c0_i32_1 = arith.constant 0 : i32
    return %arg0, %c0_i32, %c0_i32_0 : i32, i32, i32
  }
  func.func @transform_1(%arg0: i32) -> (i32, i32) {
    %c0_i32 = arith.constant 0 : i32
    %c0_i32_0 = arith.constant 0 : i32
    %c0_i32_1 = arith.constant 0 : i32
    return %c0_i32, %c0_i32_0 : i32, i32
  }
  func.func @transform_2(%arg0: i32) -> (i32, i32) {
    %c0_i32 = arith.constant 0 : i32
    %c0_i32_0 = arith.constant 0 : i32
    %c0_i32_1 = arith.constant 0 : i32
    return %c0_i32, %c0_i32_0 : i32, i32
  }
  func.func @transform_3(%arg0: i32) -> (i32, i32, i32) {
    %c0_i32 = arith.constant 0 : i32
    %c0_i32_0 = arith.constant 0 : i32
    %c0_i32_1 = arith.constant 0 : i32
    return %arg0, %c0_i32, %c0_i32_0 : i32, i32, i32
  }
}

</mosaic_0001>

<bundles_post_ra>
// kernel: tpu_custom_call.1
= control target key start
LH: loop header
LB: loop body
LE: loop exit
PB: predicated region body
PF: predicated region fallthrough
CT: control target
= control target key end

     0   :  { %8 = vsyncpa [#allocation3], 0  ;;  %s902_s0 = inlined_call_operand.hbm [shape: f32[2,64,256], index: 0, kind: input, shape index: {}]   ;;  %s903_s1 = inlined_call_operand.vmem [shape: f32[64,4], index: 1, kind: input, shape index: {}]   ;;  %s904_s2 = inlined_call_operand.vmem [shape: f32[4,64], index: 2, kind: input, shape index: {}]   ;;  %s905_s3 = inlined_call_operand.hbm [shape: f32[2,64,256], index: 3, kind: output, shape index: {}]  }
   0x1   :  { %9 = vsyncpa [#allocation4], 0  ;;  %s666_s12 = smov [#allocation2]   ;;  %s618_s16 = scalar_lea.hbm %s902_s0, 4096 }
   0x2   :  { %s15_s13 = sshll.u32 %s666_s12, 4  ;;  %p619_p0 = scmp.ne.s32.totalorder %s902_s0, %s618_s16  ;;  %s16_s13 = int_to_ptr.vmem [resolvable:$true] %s15_s13 }
   0x3   :  { %p622_p1 = scmp.lt.u32.totalorder %s618_s16, %s902_s0 }
   0x5   :  { %p624_p2 = pnand %p622_p1, %p619_p0 }
   0x7   :  { %627 = shalt.err (!%p624_p2)
}
   0x8   :  { %s628_s21 = scalar_lea.vmem %s16_s13, 4096  ;;  %p633_p4 = scmp.lt.s32.totalorder %s16_s13, %s16_s13 }
   0x9   :  { %p629_p3 = scmp.ne.s32.totalorder %s16_s13, %s628_s21  ;;  %p634_p5 = scmp.lt.s32.totalorder %s628_s21, %s628_s21 }
   0xb   :  { %p635_p6 = por %p634_p5, %p633_p4 }
   0xd   :  { %p636_p7 = pnand %p635_p6, %p629_p3 }
   0xf   :  { %639 = shalt.err (!%p636_p7)
}
  0x10   :  { %s667_s22 = smov 256   ;;  %s668_s23 = smov 16  }
  0x11   :  { %21 = dma.hbm_to_vmem [thread:$0]  %s902_s0, 4096, %s16_s13, [#allocation3], %s667_s22, %s667_s22, %s668_s23  }
  0x12   :  { %662 = dma.done.wait [#allocation3], 4096  }
  0x13   :  { %663 = vsyncadd [#allocation3], 4294963200  ;;  %v708_v0 = vld [vmem:[#allocation2 + $0x80] sm:$0xff]  ;;  %v710_v1 = vld [vmem:[#allocation2 + $0x88] sm:$0xff]  ;;  %v669_v51 = vmov 0.0|0.0   ;;  %vm670_vm0 = vmmov 0  }
  0x14   :  { %v712_v2 = vld [vmem:[#allocation2] sm:$0xff]  ;;  %v85_v3 = vadd.f32 %v710_v1, %v708_v0  ;;  %v716_v4 = vld [vmem:[#allocation2 + $0x8] sm:$0xff]  ;;  %v718_v5 = vld [vmem:[#allocation2 + $0x90] sm:$0xff]  ;;  %595 = vmatprep.subr.bf16.mxu0 %v669_v51  ;;  %v671_v61 = vmov 0.0   ;;  %vm161_vm1 = vcmask 130112   ;;  %vm168_vm2 = vcmask 195712  }
  0x15   :  { %v720_v6 = vld [vmem:[#allocation2 + $0x98] sm:$0xff]  ;;  %v61_v7 = vadd.f32 %v716_v4, %v712_v2  ;;  %v724_v8 = vld [vmem:[#allocation2 + $0x10] sm:$0xff]  ;;  %v732_v12 = vld [vmem:[#allocation2 + $0xa0] sm:$0xff]  ;;  %587 = vmatprep.mubr.msk.f32.mxu0 %vm670_vm0, %v671_v61  ;;  %590 = vmatprep.subr.mxu1 %v671_v61  ;;  %vm175_vm3 = vcmask 261312   ;;  %vm182_vm4 = vcmask 326912   ;;  %vm189_vm5 = vcmask 392512  }
  0x16   :  { %v726_v9 = vld [vmem:[#allocation2 + $0x18] sm:$0xff]  ;;  %86 = vadd.xlane.f32.xlu1 %v85_v3  ;;  %v88_v10 = vadd.f32 %v720_v6, %v718_v5  ;;  %v734_v13 = vld [vmem:[#allocation2 + $0xa8] sm:$0xff]  ;;  %v736_v14 = vld [vmem:[#allocation2 + $0x20] sm:$0xff]  ;;  %592 = vmatprep.mubr.msk.f32.mxu1 %vm670_vm0, %v671_v61  ;;  %vm196_vm6 = vcmask 458112   ;;  %vm203_vm7 = vcmask 523712   ;;  %vm244_vm8 = vcmask 1041409  }
  0x17   :  { %62 = vadd.xlane.f32.xlu0 %v61_v7  ;;  %v64_v11 = vadd.f32 %v726_v9, %v724_v8  ;;  %v738_v15 = vld [vmem:[#allocation2 + $0x28] sm:$0xff]  ;;  %v91_v16 = vadd.f32 %v734_v13, %v732_v12  ;;  %v744_v18 = vld [vmem:[#allocation2 + $0xb0] sm:$0xff]  ;;  %v746_v19 = vld [vmem:[#allocation2 + $0xb8] sm:$0xff]  ;;  %vm246_vm9 = vcmask 523264   ;;  %vm325_vm10 = vcmask 1043456  }
  0x18   :  { %v67_v17 = vadd.f32 %v738_v15, %v736_v14  ;;  %913 = vst [vmem:[#allocation8_spill] sm:$0xff] %v746_v19  ;;  %v748_v20 = vld [vmem:[#allocation2 + $0x30] sm:$0xff]  ;;  %v750_v21 = vld [vmem:[#allocation2 + $0x38] sm:$0xff]  ;;  %v94_v22 = vadd.f32 %v746_v19, %v744_v18  ;;  %v756_v24 = vld [vmem:[#allocation2 + $0xc0] sm:$0xff]  ;;  %vm321_vm11 = vcmask 31744  }
  0x19   :  { %v70_v23 = vadd.f32 %v750_v21, %v748_v20  ;;  %v758_v25 = vld [vmem:[#allocation2 + $0xc8] sm:$0xff]  ;;  %v760_v26 = vld [vmem:[#allocation2 + $0x40] sm:$0xff]  ;;  %v768_v30 = vld [vmem:[#allocation2 + $0xd0] sm:$0xff] }
  0x1a   :  { %89 = vadd.xlane.f32.xlu1 %v88_v10  ;;  %v762_v27 = vld [vmem:[#allocation2 + $0x48] sm:$0xff]  ;;  %v97_v28 = vadd.f32 %v758_v25, %v756_v24  ;;  %914 = vst [vmem:[#allocation9_spill] sm:$0xff] %v768_v30  ;;  %v770_v31 = vld [vmem:[#allocation2 + $0xd8] sm:$0xff]  ;;  %v772_v32 = vld [vmem:[#allocation2 + $0x50] sm:$0xff]  ;;  %v150_v10 = vlaneseq }
  0x1b   :  { %65 = vadd.xlane.f32.xlu0 %v64_v11  ;;  %v73_v29 = vadd.f32 %v762_v27, %v760_v26  ;;  %915 = vst [vmem:[#allocation10_spill] sm:$0xff] %v770_v31  ;;  %v774_v33 = vld [vmem:[#allocation2 + $0x58] sm:$0xff]  ;;  %v100_v34 = vadd.f32 %v770_v31, %v768_v30  ;;  %v780_v36 = vld [vmem:[#allocation2 + $0xe0] sm:$0xff]  ;;  %v782_v37 = vld [vmem:[#allocation2 + $0xe8] sm:$0xff] }
  0x1c   :  { %v76_v35 = vadd.f32 %v774_v33, %v772_v32  ;;  %916 = vst [vmem:[#allocation11_spill] sm:$0xff] %v780_v36  ;;  %917 = vst [vmem:[#allocation12_spill] sm:$0xff] %v782_v37  ;;  %v784_v38 = vld [vmem:[#allocation2 + $0x60] sm:$0xff]  ;;  %v786_v39 = vld [vmem:[#allocation2 + $0x68] sm:$0xff]  ;;  %v103_v40 = vadd.f32 %v782_v37, %v780_v36 }
  0x1d   :  { %v79_v41 = vadd.f32 %v786_v39, %v784_v38  ;;  %v792_v42 = vld [vmem:[#allocation2 + $0xf0] sm:$0xff]  ;;  %v794_v43 = vld [vmem:[#allocation2 + $0xf8] sm:$0xff]  ;;  %v126_v48 = vld [vmem:[%s903_s1] sm:$0xff] }
  0x1e   :  { %92 = vadd.xlane.f32.xlu1 %v91_v16  ;;  %918 = vst [vmem:[#allocation13_spill] sm:$0xff] %v792_v42  ;;  %919 = vst [vmem:[#allocation14_spill] sm:$0xff] %v794_v43  ;;  %v796_v44 = vld [vmem:[#allocation2 + $0x70] sm:$0xff]  ;;  %v798_v45 = vld [vmem:[#allocation2 + $0x78] sm:$0xff]  ;;  %v106_v46 = vadd.f32 %v794_v43, %v792_v42 }
  0x1f   :  { %68 = vadd.xlane.f32.xlu0 %v67_v17  ;;  %v82_v47 = vadd.f32 %v798_v45, %v796_v44  ;;  %v127_v49 = vld [vmem:[%s903_s1 + $0x8] sm:$0xff]  ;;  %v128_v52 = vld [vmem:[%s903_s1 + $0x10] sm:$0xff]  ;;  %v129_v53 = vld [vmem:[%s903_s1 + $0x18] sm:$0xff]  ;;  %v151_v17 = vand.u32 127, %v150_v10 }
  0x20   :  { %v596_v50 = vpack.c.bf16 %v127_v49, %v126_v48  ;;  %v599_v54 = vpack.c.bf16 %v129_v53, %v128_v52  ;;  %v130_v55 = vld [vmem:[%s903_s1 + $0x20] sm:$0xff]  ;;  %v131_v56 = vld [vmem:[%s903_s1 + $0x28] sm:$0xff]  ;;  %v132_v58 = vld [vmem:[%s903_s1 + $0x30] sm:$0xff] }
  0x21   :  { %v602_v57 = vpack.c.bf16 %v131_v56, %v130_v55  ;;  %v133_v59 = vld [vmem:[%s903_s1 + $0x38] sm:$0xff] }
  0x22   :  { %95 = vadd.xlane.f32.xlu1 %v94_v22  ;;  %597 = vmatpush3.bf16.msra.mxu0 %v596_v50  ;;  %v605_v60 = vpack.c.bf16 %v133_v59, %v132_v58 }
  0x23   :  { %71 = vadd.xlane.f32.xlu0 %v70_v23  ;;  %598 = vmatprep.subr.bf16.mxu0 %v669_v51  ;;  %v828_v23 = vshrl.u32 %v150_v10, 7 }
  0x26   :  { %98 = vadd.xlane.f32.xlu1 %v97_v28  ;;  %600 = vmatpush3.bf16.msra.mxu0 %v599_v54 }
  0x27   :  { %74 = vadd.xlane.f32.xlu0 %v73_v29  ;;  %601 = vmatprep.subr.bf16.mxu0 %v669_v51  ;;  %v156_v29 = vadd.s32 4294967288, %v151_v17 }
  0x29   :  { %v159_v49 = vsub.s32 %v156_v29, %v828_v23 }
  0x2a   :  { %101 = vadd.xlane.f32.xlu1 %v100_v34  ;;  %603 = vmatpush3.bf16.msra.mxu0 %v602_v57  ;;  %v163_v34 = vadd.s32 4294967280, %v151_v17 }
  0x2b   :  { %77 = vadd.xlane.f32.xlu0 %v76_v35  ;;  %604 = vmatprep.subr.bf16.mxu0 %v669_v51  ;;  %v170_v35 = vadd.s32 4294967272, %v151_v17  ;;  %v191_v51 = vadd.s32 4294967248, %v151_v17 }
  0x2c   :  { %v166_v50 = vsub.s32 %v163_v34, %v828_v23 }
  0x2d   :  { %v173_v53 = vsub.s32 %v170_v35, %v828_v23 }
  0x2e   :  { %104 = vadd.xlane.f32.xlu1 %v103_v40  ;;  %606 = vmatpush3.bf16.msra.mxu0 %v605_v60  ;;  %v177_v40 = vadd.s32 4294967264, %v151_v17 }
  0x2f   :  { %80 = vadd.xlane.f32.xlu0 %v79_v41 }
  0x30   :  { %v180_v54 = vsub.s32 %v177_v40, %v828_v23  ;;  %v198_v40 = vadd.s32 4294967240, %v151_v17 }
  0x32   :  { %107 = vadd.xlane.f32.xlu1 %v106_v46  ;;  %v184_v46 = vadd.s32 4294967256, %v151_v17 }
  0x33   :  { %83 = vadd.xlane.f32.xlu0 %v82_v47  ;;  %v154_v47 = vsub.s32 %v151_v17, %v828_v23  ;;  %v201_v17 = vsub.s32 %v198_v40, %v828_v23 }
  0x34   :  { %v187_v57 = vsub.s32 %v184_v46, %v828_v23 }
  0xa3   :  { %v87_v62 = vpop.xlane.xlu1 %86 }
  0xa4   :  { %v63_v63 = vpop.xlane.xlu0 %62  ;;  %v118_v59 = vmul.f32 0.00390625, %v87_v62 }
  0xa5   :  { %v110_v29 = vmul.f32 0.00390625, %v63_v63 }
  0xa6   :  { %v208_v37 = vrot.slane %v118_v59, %v154_v47 }
  0xa7   :  { %v90_v3 = vpop.xlane.xlu1 %89  ;;  %v155_v19 = vrot.slane %v110_v29, %v154_v47 }
  0xa8   :  { %v66_v7 = vpop.xlane.xlu0 %65  ;;  %v119_v52 = vmul.f32 0.00390625, %v90_v3  ;;  %v194_v3 = vsub.s32 %v191_v51, %v828_v23 }
  0xa9   :  { %v111_v55 = vmul.f32 0.00390625, %v66_v7 }
  0xaa   :  { %v212_v35 = vrot.slane %v119_v52, %v159_v49 }
  0xab   :  { %v93_v11 = vpop.xlane.xlu1 %92  ;;  %v160_v7 = vrot.slane %v111_v55, %v159_v49 }
  0xac   :  { %v69_v16 = vpop.xlane.xlu0 %68  ;;  %v120_v56 = vmul.f32 0.00390625, %v93_v11  ;;  %v213_v51 = vsel %vm161_vm1, %v212_v35, %v208_v37  ;;  %v320_v35 = vld [vmem:[%s904_s2] sm:$0xf]  ;;  %s672_s2 = smov [#allocation5]  }
  0xad   :  { %v112_v60 = vmul.f32 0.00390625, %v69_v16  ;;  %v162_v49 = vsel %vm161_vm1, %v160_v7, %v155_v19  ;;  %591 = vmatpush3.msk.msra.mxu1 %vm325_vm10, %v320_v35  ;;  %s544_s15 = sshll.u32 %s672_s2, 4  ;;  %s545_s15 = int_to_ptr.vmem [resolvable:$true] %s544_s15 }
  0xae   :  { %v217_v11 = vrot.slane %v120_v56, %v166_v50  ;;  %s640_s16 = scalar_lea.vmem %s545_s15, 4096  ;;  %p645_p9 = scmp.lt.s32.totalorder %s545_s15, %s545_s15 }
  0xaf   :  { %v96_v22 = vpop.xlane.xlu1 %95  ;;  %v167_v62 = vrot.slane %v112_v60, %v166_v50  ;;  %p641_p8 = scmp.ne.s32.totalorder %s545_s15, %s640_s16  ;;  %p646_p10 = scmp.lt.s32.totalorder %s640_s16, %s640_s16 }
  0xb0   :  { %v72_v28 = vpop.xlane.xlu0 %71  ;;  %v121_v61 = vmul.f32 0.00390625, %v96_v22  ;;  %v218_v55 = vsel %vm168_vm2, %v217_v11, %v213_v51 }
  0xb1   :  { %v113_v34 = vmul.f32 0.00390625, %v72_v28  ;;  %v169_v59 = vsel %vm168_vm2, %v167_v62, %v162_v49  ;;  %p647_p11 = por %p646_p10, %p645_p9 }
  0xb2   :  { %v222_v16 = vrot.slane %v121_v61, %v173_v53 }
  0xb3   :  { %v99_v41 = vpop.xlane.xlu1 %98  ;;  %v174_v63 = vrot.slane %v113_v34, %v173_v53  ;;  %p648_p12 = pnand %p647_p11, %p641_p8 }
  0xb4   :  { %v75_v48 = vpop.xlane.xlu0 %74  ;;  %v122_v43 = vmul.f32 0.00390625, %v99_v41  ;;  %v223_v47 = vsel %vm175_vm3, %v222_v16, %v218_v55 }
  0xb5   :  { %v114_v42 = vmul.f32 0.00390625, %v75_v48  ;;  %v176_v37 = vsel %vm175_vm3, %v174_v63, %v169_v59 }
  0xb6   :  { %v227_v28 = vrot.slane %v122_v43, %v180_v54 }
  0xb7   :  { %v102_v58 = vpop.xlane.xlu1 %101  ;;  %v181_v52 = vrot.slane %v114_v42, %v180_v54 }
  0xb8   :  { %v78_v10 = vpop.xlane.xlu0 %77  ;;  %v123_v31 = vmul.f32 0.00390625, %v102_v58 }
  0xb9   :  { %v115_v30 = vmul.f32 0.00390625, %v78_v10  ;;  %v183_v19 = vsel %vm182_vm4, %v181_v52, %v176_v37  ;;  %v442_v52 = vsub.s32 1, %v828_v23 }
  0xba   :  { %v232_v48 = vrot.slane %v123_v31, %v187_v57  ;;  %v228_v31 = vsel %vm182_vm4, %v227_v28, %v223_v47  ;;  %v407_v28 = vsub.s32 0, %v828_v23 }
  0xbb   :  { %v105_v46 = vpop.xlane.xlu1 %104  ;;  %v188_v56 = vrot.slane %v115_v30, %v187_v57 }
  0xbc   :  { %v124_v22 = vmul.f32 0.00390625, %v105_v46  ;;  %v81_v36 = vpop.xlane.xlu0 %80  ;;  %v233_v54 = vsel %vm189_vm5, %v232_v48, %v228_v31 }
  0xbd   :  { %v116_v41 = vmul.f32 0.00390625, %v81_v36  ;;  %v190_v57 = vsel %vm189_vm5, %v188_v56, %v183_v19 }
  0xbe   :  { %v237_v58 = vrot.slane %v124_v22, %v194_v3 }
  0xbf   :  { %v108_v50 = vpop.xlane.xlu1 %107  ;;  %v195_v53 = vrot.slane %v116_v41, %v194_v3 }
  0xc0   :  { %v125_v43 = vmul.f32 0.00390625, %v108_v50  ;;  %v84_v36 = vpop.xlane.xlu0 %83  ;;  %v238_v60 = vsel %vm196_vm6, %v237_v58, %v233_v54 }
  0xc1   :  { %v117_v42 = vmul.f32 0.00390625, %v84_v36  ;;  %v197_v10 = vsel %vm196_vm6, %v195_v53, %v190_v57 }
  0xc2   :  { %v242_v30 = vrot.slane %v125_v43, %v201_v17 }
  0xc3   :  { %v202_v61 = vrot.slane %v117_v42, %v201_v17 }
  0xc4   :  { %v243_v29 = vsel %vm203_vm7, %v242_v30, %v238_v60  ;;  %v920_v60 = vld [vmem:[#allocation8_spill] sm:$0xff] }
  0xc5   :  { %v204_v34 = vsel %vm203_vm7, %v202_v61, %v197_v10  ;;  %v921_v10 = vld [vmem:[#allocation11_spill] sm:$0xff] }
  0xc6   :  { %v245_v3 = vsel %vm244_vm8, %v243_v29, %v204_v34  ;;  %v922_v34 = vld [vmem:[#allocation12_spill] sm:$0xff] }
  0xc7   :  { %588 = vmatmul.mubr.msk.f32.vlgmr.msra.gmra.mrb[0].mxu0 %vm246_vm9, %v245_v3  ;;  %v924_v3 = vld [vmem:[#allocation10_spill] sm:$0xff] }
 0x19a   :  { %v315_v40 = vpop.f32.mrb[0].mxu0 }
 0x19b   :  { %v319_v7 = vmax.f32 %v315_v40, 0.0  ;;  %v589_v11 = vpop.f32.mrb[1].mxu0  ;;  %v925_v40 = vld [vmem:[#allocation13_spill] sm:$0xff] }
 0x19c   :  { %v926_v11 = vld [vmem:[#allocation14_spill] sm:$0xff] }
 0x19d   :  { %593 = vmatmul.mubr.msk.f32.vlgmr.msra.gmra.mrb[0].mxu1 %vm321_vm11, %v319_v7 }
 0x270   :  { %v395_v46 = vpop.f32.mrb[0].mxu1 }
 0x271   :  { %v559_v62 = vmul.f32 -1.442695, %v395_v46  ;;  %v594_v16 = vpop.f32.mrb[1].mxu1 }
 0x273   :  { %614 = vpow2.f32 %v559_v62 }
 0x27d   :  { %v615_v22 = vpop.eup %614 }
 0x27e   :  { %v402_v63 = vadd.f32 1.0, %v615_v22 }
 0x280   :  { %616 = vrcp.f32 %v402_v63 }
 0x28a   :  { %v617_v41 = vpop.eup %616 }
 0x28b   :  { %v408_v51 = vrot.slane %v617_v41, %v407_v28  ;;  %v443_v48 = vrot.slane %v617_v41, %v442_v52 }
 0x28d   :  { %414 = vbcast.lane.b32.xlu1 %v408_v51, 264  ;;  %410 = vbcast.lane.b32.xlu0 %v408_v51, 256 }
 0x291   :  { %418 = vbcast.lane.b32.xlu1 %v408_v51, 272  ;;  %426 = vbcast.lane.b32.xlu0 %v408_v51, 288 }
 0x295   :  { %422 = vbcast.lane.b32.xlu1 %v408_v51, 280  ;;  %434 = vbcast.lane.b32.xlu0 %v408_v51, 304 }
 0x299   :  { %430 = vbcast.lane.b32.xlu1 %v408_v51, 296  ;;  %445 = vbcast.lane.b32.xlu0 %v443_v48, 256 }
 0x29d   :  { %438 = vbcast.lane.b32.xlu1 %v408_v51, 312  ;;  %453 = vbcast.lane.b32.xlu0 %v443_v48, 272 }
 0x2a1   :  { %449 = vbcast.lane.b32.xlu1 %v443_v48, 264  ;;  %461 = vbcast.lane.b32.xlu0 %v443_v48, 288 }
 0x2a5   :  { %457 = vbcast.lane.b32.xlu1 %v443_v48, 280  ;;  %469 = vbcast.lane.b32.xlu0 %v443_v48, 304 }
 0x2a9   :  { %465 = vbcast.lane.b32.xlu1 %v443_v48, 296 }
 0x2ad   :  { %473 = vbcast.lane.b32.xlu1 %v443_v48, 312 }
 0x2ff   :  { %v415_v17 = vpop.permute.xlu1 %414  ;;  %v411_v49 = vpop.permute.xlu0 %410 }
 0x300   :  { %v477_v55 = vmul.f32 %v415_v17, %v724_v8  ;;  %v478_v56 = vmul.f32 %v415_v17, %v726_v9  ;;  %v475_v23 = vmul.f32 %v411_v49, %v712_v2  ;;  %v476_v58 = vmul.f32 %v411_v49, %v716_v4 }
 0x302   :  { %509 = vst [vmem:[#allocation5 + $0x10] sm:$0xff] %v477_v55  ;;  %510 = vst [vmem:[#allocation5 + $0x18] sm:$0xff] %v478_v56 }
 0x303   :  { %507 = vst [vmem:[#allocation5] sm:$0xff] %v475_v23  ;;  %508 = vst [vmem:[#allocation5 + $0x8] sm:$0xff] %v476_v58  ;;  %v419_v50 = vpop.permute.xlu1 %418  ;;  %v427_v59 = vpop.permute.xlu0 %426 }
 0x304   :  { %v479_v47 = vmul.f32 %v419_v50, %v736_v14  ;;  %v480_v53 = vmul.f32 %v419_v50, %v738_v15  ;;  %v483_v43 = vmul.f32 %v427_v59, %v760_v26  ;;  %v484_v8 = vmul.f32 %v427_v59, %v762_v27 }
 0x306   :  { %511 = vst [vmem:[#allocation5 + $0x20] sm:$0xff] %v479_v47  ;;  %512 = vst [vmem:[#allocation5 + $0x28] sm:$0xff] %v480_v53 }
 0x307   :  { %515 = vst [vmem:[#allocation5 + $0x40] sm:$0xff] %v483_v43  ;;  %516 = vst [vmem:[#allocation5 + $0x48] sm:$0xff] %v484_v8  ;;  %v423_v2 = vpop.permute.xlu1 %422  ;;  %v435_v4 = vpop.permute.xlu0 %434 }
 0x308   :  { %v481_v9 = vmul.f32 %v423_v2, %v748_v20  ;;  %v482_v36 = vmul.f32 %v423_v2, %v750_v21  ;;  %v487_v37 = vmul.f32 %v435_v4, %v784_v38  ;;  %v488_v14 = vmul.f32 %v435_v4, %v786_v39 }
 0x30a   :  { %513 = vst [vmem:[#allocation5 + $0x30] sm:$0xff] %v481_v9  ;;  %514 = vst [vmem:[#allocation5 + $0x38] sm:$0xff] %v482_v36 }
 0x30b   :  { %519 = vst [vmem:[#allocation5 + $0x60] sm:$0xff] %v487_v37  ;;  %520 = vst [vmem:[#allocation5 + $0x68] sm:$0xff] %v488_v14  ;;  %v431_v15 = vpop.permute.xlu1 %430  ;;  %v446_v26 = vpop.permute.xlu0 %445 }
 0x30c   :  { %v485_v27 = vmul.f32 %v431_v15, %v772_v32  ;;  %v486_v31 = vmul.f32 %v431_v15, %v774_v33  ;;  %v491_v42 = vmul.f32 %v446_v26, %v708_v0  ;;  %v492_v20 = vmul.f32 %v446_v26, %v710_v1 }
 0x30e   :  { %517 = vst [vmem:[#allocation5 + $0x50] sm:$0xff] %v485_v27  ;;  %518 = vst [vmem:[#allocation5 + $0x58] sm:$0xff] %v486_v31 }
 0x30f   :  { %523 = vst [vmem:[#allocation5 + $0x80] sm:$0xff] %v491_v42  ;;  %524 = vst [vmem:[#allocation5 + $0x88] sm:$0xff] %v492_v20  ;;  %v439_v21 = vpop.permute.xlu1 %438  ;;  %v454_v38 = vpop.permute.xlu0 %453 }
 0x310   :  { %v489_v39 = vmul.f32 %v439_v21, %v796_v44  ;;  %v490_v19 = vmul.f32 %v439_v21, %v798_v45  ;;  %v495_v54 = vmul.f32 %v454_v38, %v732_v12  ;;  %v496_v32 = vmul.f32 %v454_v38, %v734_v13 }
 0x312   :  { %521 = vst [vmem:[#allocation5 + $0x70] sm:$0xff] %v489_v39  ;;  %522 = vst [vmem:[#allocation5 + $0x78] sm:$0xff] %v490_v19 }
 0x313   :  { %527 = vst [vmem:[#allocation5 + $0xa0] sm:$0xff] %v495_v54  ;;  %528 = vst [vmem:[#allocation5 + $0xa8] sm:$0xff] %v496_v32  ;;  %v450_v0 = vpop.permute.xlu1 %449  ;;  %v462_v1 = vpop.permute.xlu0 %461 }
 0x314   :  { %v493_v33 = vmul.f32 %v450_v0, %v718_v5  ;;  %v494_v30 = vmul.f32 %v450_v0, %v720_v6  ;;  %v499_v57 = vmul.f32 %v462_v1, %v756_v24  ;;  %v500_v44 = vmul.f32 %v462_v1, %v758_v25  ;;  %v923_v24 = vld [vmem:[#allocation9_spill] sm:$0xff] }
 0x316   :  { %525 = vst [vmem:[#allocation5 + $0x90] sm:$0xff] %v493_v33  ;;  %526 = vst [vmem:[#allocation5 + $0x98] sm:$0xff] %v494_v30 }
 0x317   :  { %531 = vst [vmem:[#allocation5 + $0xc0] sm:$0xff] %v499_v57  ;;  %532 = vst [vmem:[#allocation5 + $0xc8] sm:$0xff] %v500_v44  ;;  %v458_v12 = vpop.permute.xlu1 %457  ;;  %v470_v13 = vpop.permute.xlu0 %469 }
 0x318   :  { %v497_v45 = vmul.f32 %v458_v12, %v744_v18  ;;  %v498_v61 = vmul.f32 %v458_v12, %v920_v60  ;;  %v503_v29 = vmul.f32 %v470_v13, %v921_v10  ;;  %v504_v5 = vmul.f32 %v470_v13, %v922_v34 }
 0x31a   :  { %529 = vst [vmem:[#allocation5 + $0xb0] sm:$0xff] %v497_v45  ;;  %530 = vst [vmem:[#allocation5 + $0xb8] sm:$0xff] %v498_v61 }
 0x31b   :  { %535 = vst [vmem:[#allocation5 + $0xe0] sm:$0xff] %v503_v29  ;;  %536 = vst [vmem:[#allocation5 + $0xe8] sm:$0xff] %v504_v5  ;;  %v466_v6 = vpop.permute.xlu1 %465 }
 0x31c   :  { %v501_v25 = vmul.f32 %v466_v6, %v923_v24  ;;  %v502_v35 = vmul.f32 %v466_v6, %v924_v3 }
 0x31e   :  { %533 = vst [vmem:[#allocation5 + $0xd0] sm:$0xff] %v501_v25  ;;  %534 = vst [vmem:[#allocation5 + $0xd8] sm:$0xff] %v502_v35 }
 0x31f   :  { %v474_v18 = vpop.permute.xlu1 %473 }
 0x320   :  { %v505_v7 = vmul.f32 %v474_v18, %v925_v40  ;;  %v506_v46 = vmul.f32 %v474_v18, %v926_v11 }
 0x322   :  { %537 = vst [vmem:[#allocation5 + $0xf0] sm:$0xff] %v505_v7  ;;  %538 = vst [vmem:[#allocation5 + $0xf8] sm:$0xff] %v506_v46 }
 0x323   :  { %651 = shalt.err (!%p648_p12)
}
 0x324   :  { %s652_s19 = scalar_lea.hbm %s905_s3, 4096 }
 0x325   :  { %p653_p13 = scmp.ne.s32.totalorder %s905_s3, %s652_s19  ;;  %p656_p0 = scmp.lt.u32.totalorder %s652_s19, %s905_s3 }
 0x327   :  { %p658_p1 = pnand %p656_p0, %p653_p13 }
 0x329   :  { %661 = shalt.err (!%p658_p1)
}
 0x32a   :  { %550 = dma.vmem_to_hbm [thread:$0]  %s545_s15, 4096, %s905_s3, [#allocation4], %s667_s22, %s667_s22, %s668_s23  }
 0x32b   :  { %664 = dma.done.wait [#allocation4], 4096  }
 0x32c   :  { %665 = vsyncadd [#allocation4], 4294963200 }
 0x32d   :  { %554 = vsyncpa [#allocation3], 1 }
 0x32e   :  { %555 = vsyncpa [#allocation4], 1 }

</bundles_post_ra>
